<compile_context>
chip_gen: v6e
topology: v6e:2x2x1
jax: 0.10.0
libtpu: 0.0.40
codegen_flags: <defaults>
</compile_context>

<pallas_src>
import functools

import jax
import jax.numpy as jnp
from jax.experimental import pallas as pl
from jax.experimental.pallas import tpu as pltpu


def _round_up(x, m):
    return (x + m - 1) // m * m


def _pad2(x, rows, cols):
    pr, pc = rows - x.shape[0], cols - x.shape[1]
    if pr == 0 and pc == 0:
        return x
    return jnp.pad(x, ((0, pr), (0, pc)))


def _device_kind():
    try:
        return jax.devices()[0].device_kind.lower()
    except Exception:
        return ""


def _choose_tiles(n):
    """(TM, TK, N_padded) for the node axis, sized per TPU generation."""
    if n <= 1024:
        t = _round_up(n, 8)            # single block; block dims == full array dims
        return t, t, t
    if "v7" in _device_kind():         # v7x: 64 MiB VMEM per TensorCore
        tm, tk = 256, 1024
    else:                              # v5e / v6e: 128 MiB VMEM
        tm, tk = 512, 2048
    return tm, tk, _round_up(n, tk)    # tk is a multiple of tm


def _vmem_limit_bytes():
    return (48 << 20) if "v7" in _device_kind() else (96 << 20)


# --------------------------------------------------------------------------------------
# Projection kernel: per node-row tile, P = H @ W_neigh (bf16) and S = H @ W_self + bias.
# --------------------------------------------------------------------------------------

def _proj_kernel(h_ref, wn_ref, ws_ref, b_ref, p_ref, s_ref):
    h = h_ref[...]
    p_ref[...] = jnp.dot(h, wn_ref[...],
                         preferred_element_type=jnp.float32).astype(p_ref.dtype)
    s_ref[...] = (jnp.dot(h, ws_ref[...], preferred_element_type=jnp.float32)
                  + b_ref[...])


def _project(h_p, wn_p, ws_p, b_p, *, tp):
    np_, f_in_p = h_p.shape
    f_out_p = wn_p.shape[1]
    return pl.pallas_call(
        _proj_kernel,
        out_shape=(jax.ShapeDtypeStruct((np_, f_out_p), jnp.bfloat16),   # P (feeds MXU)
                   jax.ShapeDtypeStruct((np_, f_out_p), jnp.float32)),   # S (self path)
        grid=(np_ // tp,),
        in_specs=[
            pl.BlockSpec((tp, f_in_p), lambda i: (i, 0)),          # H row tile
            pl.BlockSpec((f_in_p, f_out_p), lambda i: (0, 0)),     # W_neigh (resident)
            pl.BlockSpec((f_in_p, f_out_p), lambda i: (0, 0)),     # W_self  (resident)
            pl.BlockSpec((1, f_out_p), lambda i: (0, 0)),          # bias    (resident)
        ],
        out_specs=(pl.BlockSpec((tp, f_out_p), lambda i: (i, 0)),
                   pl.BlockSpec((tp, f_out_p), lambda i: (i, 0))),
        compiler_params=pltpu.CompilerParams(
            dimension_semantics=("parallel",),
            vmem_limit_bytes=_vmem_limit_bytes(),
        ),
    )(h_p, wn_p, ws_p, b_p)


# --------------------------------------------------------------------------------------
# Aggregation kernel: acc += A_tile @ P_tile (bf16 MXU, f32 acc); finalize S + inv*acc.
# --------------------------------------------------------------------------------------

def _agg_kernel(a_ref, p_ref, s_ref, inv_ref, o_ref, acc_ref, *, apply_relu):
    k = pl.program_id(1)

    @pl.when(k == 0)
    def _init():
        acc_ref[...] = jnp.zeros_like(acc_ref)

    acc_ref[...] += jnp.dot(a_ref[...], p_ref[...],
                            preferred_element_type=jnp.float32)

    @pl.when(k == pl.num_programs(1) - 1)
    def _finalize():
        out = s_ref[...] + inv_ref[...] * acc_ref[...]
        if apply_relu:
            out = jnp.maximum(out, 0.0)
        o_ref[...] = out.astype(o_ref.dtype)


def sage_conv_mean(adj_p, h_p, inv_deg_p, w_self, w_neigh, bias, *,
                   apply_relu, tm, tk):
    """One fused, tiled SAGEConv('mean') layer.

    adj_p     : (Np, Np) bf16, zero-padded 0/1 adjacency
    h_p       : (Np, F_in_p) f32 node features (rows >= N are zero / ignored)
    inv_deg_p : (Np, 1) f32 precomputed 1/deg (0 for zero-degree / padded rows)
    Returns (Np, F_out_p) f32 with F_out_p = round_up(F_out, 128) lane-dense columns.
    """
    np_ = adj_p.shape[0]
    f_in_p = h_p.shape[1]
    f_out_p = _round_up(w_self.shape[1], 128)        # lane-dense output

    ws_p = _pad2(w_self.astype(jnp.float32), f_in_p, f_out_p)
    wn_p = _pad2(w_neigh.astype(jnp.float32), f_in_p, f_out_p)
    b_p = _pad2(bias.reshape(1, -1).astype(jnp.float32), 1, f_out_p)

    # Hoisted projections: computed once per node instead of once per (row-tile, K-tile).
    p_bf16, s_f32 = _project(h_p, wn_p, ws_p, b_p, tp=tm)

    num_m, num_k = np_ // tm, np_ // tk
    kernel = functools.partial(_agg_kernel, apply_relu=apply_relu)

    cost = pl.CostEstimate(
        flops=int(2 * np_ * np_ * f_out_p),                     # A @ P
        transcendentals=0,
        bytes_accessed=int(adj_p.size * 2                       # A read once
                           + p_bf16.size * 2 * num_m            # P panel per row tile
                           + (s_f32.size + np_ * f_out_p) * 4   # S in, out
                           + np_ * 4),                          # inv_deg
    )

    return pl.pallas_call(
        kernel,
        out_shape=jax.ShapeDtypeStruct((np_, f_out_p), jnp.float32),
        grid=(num_m, num_k),
        in_specs=[
            pl.BlockSpec((tm, tk), lambda i, k: (i, k)),         # A tile (bf16)
            pl.BlockSpec((tk, f_out_p), lambda i, k: (k, 0)),    # P K-panel (bf16)
            pl.BlockSpec((tm, f_out_p), lambda i, k: (i, 0)),    # S rows (f32)
            pl.BlockSpec((tm, 1), lambda i, k: (i, 0)),          # inv_deg rows
        ],
        out_specs=pl.BlockSpec((tm, f_out_p), lambda i, k: (i, 0)),
        scratch_shapes=[pltpu.VMEM((tm, f_out_p), jnp.float32)],
        compiler_params=pltpu.CompilerParams(
            dimension_semantics=("parallel", "arbitrary"),
            vmem_limit_bytes=_vmem_limit_bytes(),
        ),
        cost_estimate=cost,
    )(adj_p, p_bf16, s_f32, inv_deg_p)


def sage_mean_forward(adj, features, params, *, tiles=None):
    """SAGE_MEAN.forward in inference mode (dropout = identity)."""
    n = adj.shape[0]
    if tiles is None:
        tm, tk, np_ = _choose_tiles(n)
    else:
        tm, tk = tiles
        np_ = _round_up(n, max(tm, tk))
        assert np_ % tm == 0 and np_ % tk == 0
    f_out = params["w_self_1"].shape[1]

    adj_p = _pad2(adj.astype(jnp.float32), np_, np_).astype(jnp.bfloat16)  # 0/1 exact in bf16
    h_p = _pad2(features.astype(jnp.float32), np_, features.shape[1])

    # Full-row degree computed ONCE and shared by both layers (K-tiled partial sums
    # inside the kernel would be wrong).
    deg = jnp.sum(adj.astype(jnp.float32), axis=-1, keepdims=True)
    inv_deg = jnp.where(deg > 0.0, 1.0 / deg, 0.0).astype(jnp.float32)
    inv_deg_p = _pad2(inv_deg, np_, 1)

    # layer 0: SAGEConv -> ReLU -> (dropout no-op in eval)
    h1 = sage_conv_mean(adj_p, h_p, inv_deg_p,
                        params["w_self_0"], params["w_neigh_0"], params["b_0"],
                        apply_relu=True, tm=tm, tk=tk)
    # layer 1: SAGEConv (no activation); h1 stays lane-dense padded (Np, 128)
    out = sage_conv_mean(adj_p, h1, inv_deg_p,
                         params["w_self_1"], params["w_neigh_1"], params["b_1"],
                         apply_relu=False, tm=tm, tk=tk)
    return out[:n, :f_out]


def init_params(key, in_size, hid_size, out_size):
    ks = jax.random.split(key, 4)

    def xavier(k, fan_in, fan_out):
        scale = jnp.sqrt(6.0 / (fan_in + fan_out))
        return jax.random.uniform(k, (fan_in, fan_out), jnp.float32, -scale, scale)

    return {
        "w_self_0": xavier(ks[0], in_size, hid_size),
        "w_neigh_0": xavier(ks[1], in_size, hid_size),
        "b_0": jnp.zeros((hid_size,), jnp.float32),
        "w_self_1": xavier(ks[2], hid_size, out_size),
        "w_neigh_1": xavier(ks[3], hid_size, out_size),
        "b_1": jnp.zeros((out_size,), jnp.float32),
    }


if __name__ == "__main__":
    key = jax.random.PRNGKey(0)
    k_adj, k_feat, k_param = jax.random.split(key, 3)

    N = 256
    IN_SIZE = 32
    HID_SIZE = 32
    OUT_SIZE = 16

    # random sparse-ish directed adjacency (no self loops required)
    adj = (jax.random.uniform(k_adj, (N, N)) < 0.3).astype(jnp.float32)
    features = jax.random.normal(k_feat, (N, IN_SIZE), jnp.float32)
    params = init_params(k_param, IN_SIZE, HID_SIZE, OUT_SIZE)

    # Force a multi-tile grid (2 row tiles x 2 K tiles) to exercise the pipelined
    # accumulation path even at this small size.
    out = sage_mean_forward(adj, features, params, tiles=(128, 128))
    out = jax.block_until_ready(out)

    # pure-JAX f32 reference
    deg = adj.sum(-1, keepdims=True)
    inv = jnp.where(deg > 0, 1.0 / deg, 0.0)
    h_n = (adj @ features) * inv
    h1 = jnp.maximum(
        features @ params["w_self_0"] + h_n @ params["w_neigh_0"] + params["b_0"], 0.0)
    h1_n = (adj @ h1) * inv
    ref = h1 @ params["w_self_1"] + h1_n @ params["w_neigh_1"] + params["b_1"]

    assert out.shape == (N, OUT_SIZE)
    # A is exact in bf16; the only bf16 rounding is on the P = H @ W_neigh panel feeding
    # the MXU (f32 accumulation), so error vs. the pure-f32 reference is ~1e-3 here.
    err = float(jnp.max(jnp.abs(out - ref)))
    assert jnp.allclose(out, ref, atol=2e-2, rtol=2e-2), f"max abs err {err}"

    print("KERNEL_OK")
</pallas_src>

<mosaic_0001>
module attributes {stable_mosaic.version = 11 : i64} {
  func.func @_proj_kernel(%arg0: i32, %arg1: memref<128x32xf32, #tpu.memory_space<vmem>>, %arg2: memref<32x128xf32, #tpu.memory_space<vmem>>, %arg3: memref<32x128xf32, #tpu.memory_space<vmem>>, %arg4: memref<1x128xf32, #tpu.memory_space<vmem>>, %arg5: memref<128x128xbf16, #tpu.memory_space<vmem>>, %arg6: memref<128x128xf32, #tpu.memory_space<vmem>>) attributes {dimension_semantics = [#tpu.dimension_semantics<parallel>], iteration_bounds = array<i64: 2>, scalar_prefetch = 0 : i64, scratch_operands = 0 : i64, tpu.core_type = #tpu.core_type<tc>, window_params = [{transform_indices = @transform_0, window_bounds = array<i64: 128, 32>}, {pipeline_mode = #tpu.pipeline_mode<synchronous>, transform_indices = @transform_1, window_bounds = array<i64: 32, 128>}, {pipeline_mode = #tpu.pipeline_mode<synchronous>, transform_indices = @transform_2, window_bounds = array<i64: 32, 128>}, {pipeline_mode = #tpu.pipeline_mode<synchronous>, transform_indices = @transform_3, window_bounds = array<i64: 1, 128>}, {transform_indices = @transform_4, window_bounds = array<i64: 128, 128>}, {transform_indices = @transform_5, window_bounds = array<i64: 128, 128>}]} {
    %c0 = arith.constant 0 : index
    %c0_0 = arith.constant 0 : index
    %0 = vector.load %arg1[%c0, %c0_0] : memref<128x32xf32, #tpu.memory_space<vmem>>, vector<128x32xf32>
    %c0_1 = arith.constant 0 : index
    %c0_2 = arith.constant 0 : index
    %1 = vector.load %arg2[%c0_1, %c0_2] : memref<32x128xf32, #tpu.memory_space<vmem>>, vector<32x128xf32>
    %cst = arith.constant dense<0.000000e+00> : vector<128x128xf32>
    %2 = tpu.matmul %0, %1, %cst {dimension_numbers = #tpu.dot_dimension_numbers<[1], [0], [0], [1], [0, 0, 1, 1], [], []>} : vector<128x32xf32>, vector<32x128xf32>, vector<128x128xf32> -> vector<128x128xf32>
    %3 = arith.truncf %2 : vector<128x128xf32> to vector<128x128xbf16>
    %c0_3 = arith.constant 0 : index
    %c0_4 = arith.constant 0 : index
    %4 = vector.load %arg5[%c0_3, %c0_4] : memref<128x128xbf16, #tpu.memory_space<vmem>>, vector<128x128xbf16>
    tpu.vector_store %arg5[%c0_3, %c0_4], %3 {strides = array<i32>} : memref<128x128xbf16, #tpu.memory_space<vmem>>, vector<128x128xbf16>,
    %c0_5 = arith.constant 0 : index
    %c0_6 = arith.constant 0 : index
    %5 = vector.load %arg3[%c0_5, %c0_6] : memref<32x128xf32, #tpu.memory_space<vmem>>, vector<32x128xf32>
    %cst_7 = arith.constant dense<0.000000e+00> : vector<128x128xf32>
    %6 = tpu.matmul %0, %5, %cst_7 {dimension_numbers = #tpu.dot_dimension_numbers<[1], [0], [0], [1], [0, 0, 1, 1], [], []>} : vector<128x32xf32>, vector<32x128xf32>, vector<128x128xf32> -> vector<128x128xf32>
    %c0_8 = arith.constant 0 : index
    %c0_9 = arith.constant 0 : index
    %7 = vector.load %arg4[%c0_8, %c0_9] : memref<1x128xf32, #tpu.memory_space<vmem>>, vector<1x128xf32>
    %8 = vector.broadcast %7 : vector<1x128xf32> to vector<128x128xf32>
    %9 = arith.addf %6, %8 : vector<128x128xf32>
    %c0_10 = arith.constant 0 : index
    %c0_11 = arith.constant 0 : index
    %10 = vector.load %arg6[%c0_10, %c0_11] : memref<128x128xf32, #tpu.memory_space<vmem>>, vector<128x128xf32>
    tpu.vector_store %arg6[%c0_10, %c0_11], %9 {strides = array<i32>} : memref<128x128xf32, #tpu.memory_space<vmem>>, vector<128x128xf32>,
    return
  }
  func.func @transform_0(%arg0: i32) -> (i32, i32) {
    %c0_i32 = arith.constant 0 : i32
    %c0_i32_0 = arith.constant 0 : i32
    return %arg0, %c0_i32 : i32, i32
  }
  func.func @transform_1(%arg0: i32) -> (i32, i32) {
    %c0_i32 = arith.constant 0 : i32
    %c0_i32_0 = arith.constant 0 : i32
    %c0_i32_1 = arith.constant 0 : i32
    return %c0_i32, %c0_i32_0 : i32, i32
  }
  func.func @transform_2(%arg0: i32) -> (i32, i32) {
    %c0_i32 = arith.constant 0 : i32
    %c0_i32_0 = arith.constant 0 : i32
    %c0_i32_1 = arith.constant 0 : i32
    return %c0_i32, %c0_i32_0 : i32, i32
  }
  func.func @transform_3(%arg0: i32) -> (i32, i32) {
    %c0_i32 = arith.constant 0 : i32
    %c0_i32_0 = arith.constant 0 : i32
    %c0_i32_1 = arith.constant 0 : i32
    return %c0_i32, %c0_i32_0 : i32, i32
  }
  func.func @transform_4(%arg0: i32) -> (i32, i32) {
    %c0_i32 = arith.constant 0 : i32
    %c0_i32_0 = arith.constant 0 : i32
    return %arg0, %c0_i32 : i32, i32
  }
  func.func @transform_5(%arg0: i32) -> (i32, i32) {
    %c0_i32 = arith.constant 0 : i32
    %c0_i32_0 = arith.constant 0 : i32
    return %arg0, %c0_i32 : i32, i32
  }
}

</mosaic_0001>

<bundles_post_ra>
// kernel: tpu_custom_call.1
= control target key start
LH: loop header
LB: loop body
LE: loop exit
PB: predicated region body
PF: predicated region fallthrough
CT: control target
= control target key end

     0   :  { %11 = vsyncpa [#allocation3], 0  ;;  %s1504_s0 = inlined_call_operand.vmem [shape: f32[256,32], index: 0, kind: input, shape index: {}]   ;;  %s1505_s1 = inlined_call_operand.vmem [shape: f32[32,128], index: 1, kind: input, shape index: {}]   ;;  %s1506_s2 = inlined_call_operand.vmem [shape: f32[32,128], index: 2, kind: input, shape index: {}]   ;;  %s1507_s3 = inlined_call_operand.vmem [shape: f32[1,128], index: 3, kind: input, shape index: {}]   ;;  %s1508_s4 = inlined_call_operand.hbm [shape: bf16[256,128], index: 4, kind: output, shape index: {0}]   ;;  %s1509_s5 = inlined_call_operand.hbm [shape: f32[256,128], index: 5, kind: output, shape index: {1}]  }
   0x1   :  { %13 = vsyncpa [#allocation3 + $0x1], 0 }
   0x2   :  { %14 = vsyncpa [#allocation5], 0 }
   0x3   :  { %16 = vsyncpa [#allocation5 + $0x1], 0  ;;  %s1243_s18 = smov 0   ;;  %s1245_s19 = smov 0  }
   0x4   :  { %s1247_s20 = smov 0   ;;  %s1249_s21 = smov 0  }
   0x5 LB: > { %s1264_s22 = sadd.s32 4294967295, %s1205_s21   ;;  %s833_s23 = sadd.s32 4294967294, %s1205_s21   ;;  %s1205_s21 = sphi %s1249_s21, %s1515_s21   ;;  %s1201_s20 = sphi %s1247_s20, %s1514_s20   ;;  %s1197_s19 = sphi %s1245_s19, %s1513_s19   ;;  %s1193_s18 = sphi %s1243_s18, %s1512_s18  }
   0x6   : > { %s1268_s24 = sadd.s32 1, %s1205_s21   ;;  %s118_s25 = sadd.s32 1, %s1201_s20 }
   0x7   : > { %s115_s26 = ssub.s32 %s1205_s21, %s1268_s24  ;;  %p128_p0 = scmp.ne.s32.totalorder %s1201_s20, %s1197_s19 }
   0x8   : > { %p116_p1 = scmp.eq.s32.totalorder %s115_s26, 0  ;;  %p129_p2 = scmp.eq.s32.totalorder %s1264_s22, 1 }
   0x9   : > { %p134_p3 = scmp.ne.s32.totalorder %s1197_s19, %s1193_s18  ;;  %p135_p4 = scmp.eq.s32.totalorder %s833_s23, 1 }
   0xa   : > { %s1279_s27 = scalar_select %p116_p1, %s1201_s20, %s118_s25  }
   0xb   : > { %p1281_p5 = por %p129_p2, %p128_p0  ;;  %p1285_p6 = por %p135_p4, %p134_p3 }
   0xc   : > { %p836_p7 = scmp.ge.s32.totalorder %s1205_s21, 1  ;;  %p197_p8 = scmp.lt.s32.totalorder %s1205_s21, 3 }
   0xe   : > { %p198_p9 = pnand %p836_p7, %p197_p8 }
   0xf   : > { %s839_s11 = sshll.u32 (!%p198_p9), %s1264_s22, 4  ;;  %s1370_s10 = sand.u32 (!%p198_p9), 1, %s1197_s19  }
  0x10   : > { %201 = sbr.rel (%p198_p9) target bundleno = 294 (0x126), region = 36  ;;  %p231_p10 = scmp.lt.s32.totalorder (!%p198_p9), %s839_s11, 31 }
  0x11   : > { %s837_s14 = sshll.u32 (!%p198_p9), %s1370_s10, 6  ;;  %s914_s17 = sshll.u32 (!%p198_p9), %s1264_s22, 10 }
  0x12   : > { %s1384_s16 = scalar_lea.vmem (!%p198_p9), [#allocation2], %s837_s14  ;;  %s915_s25 = sshll.u32 (!%p198_p9), %s1264_s22, 11 }
  0x13   : > { %s723_s23 = sshll.u32 (!%p198_p9), %s1384_s16, 4  ;;  %s1426_s7 = scalar_lea.hbm (!%p198_p9), %s1508_s4, %s914_s17  ;;  %s1428_s23 = int_to_ptr.vmem [resolvable:$true] %s723_s23 }
  0x14   : > { %s1115_s12 = scalar_lea.vmem (!%p198_p9), %s1428_s23, 1024  ;;  %s1207_s13 = smov (!%p198_p9), [#allocation2]  }
  0x15   : > { %v257_v0 = vld [vmem:[%s1505_s1 + $0x18] sm:$0xff]  ;;  %v256_v2 = vld [vmem:[%s1505_s1 + $0x10] sm:$0xff]  ;;  %v255_v4 = vld [vmem:[%s1505_s1 + $0x8] sm:$0xff]  ;;  %s1517_s11 = smov (!%p231_p10, %s839_s11), 31  ;;  %vm258_vm0 = vcmask 261120   ;;  %p1116_p11 = scmp.ne.s32.totalorder %s1428_s23, %s1115_s12 }
  0x16   : > { %v535_v1 = vld [vmem:[%s1506_s2 + $0x18] sm:$0xff]  ;;  %1003 = vmatprep.subr.mxu0 %v257_v0  ;;  %v534_v3 = vld [vmem:[%s1506_s2 + $0x10] sm:$0xff]  ;;  %v533_v5 = vld [vmem:[%s1506_s2 + $0x8] sm:$0xff]  ;;  %s840_s6 = sshll.u32 %s1517_s11, 3  ;;  %s838_s11 = sshll.u32 %s1370_s10, 7 }
  0x17   : > { %1035 = vmatprep.subr.mxu1 %v535_v1  ;;  %1004 = vmatpush3.msra.mxu0 %v257_v0  ;;  %v254_v6 = vld [vmem:[%s1505_s1] sm:$0xff]  ;;  %s1319_s9 = scalar_lea.vmem %s1504_s0, %s840_s6  ;;  %s1380_s15 = scalar_lea.vmem [#allocation4], %s838_s11 }
  0x18   : > { %1036 = vmatpush3.msra.mxu1 %v535_v1  ;;  %1005 = vmatprep.subr.mxu0 %v256_v2  ;;  %v532_v7 = vld [vmem:[%s1506_s2] sm:$0xff]  ;;  %v239_v9 = vld [vmem:[%s1319_s9 + $0x8] sm:$0xff]  ;;  %v240_v10 = vld [vmem:[%s1319_s9 + $0x10] sm:$0xff]  ;;  %s739_s26 = sshll.u32 %s1380_s15, 4  ;;  %s705_s11 = scalar_lea.sflag [#allocation3], %s1370_s10  ;;  %s1437_s26 = int_to_ptr.vmem [resolvable:$true] %s739_s26 }
  0x19   : > { %1037 = vmatprep.subr.mxu1 %v534_v3  ;;  %1006 = vmatpush3.msra.mxu0 %v256_v2  ;;  %v238_v8 = vld [vmem:[%s1319_s9] sm:$0xff]  ;;  %v241_v11 = vld [vmem:[%s1319_s9 + $0x18] sm:$0xff]  ;;  %v243_v13 = vld [vmem:[%s1319_s9 + $0x28] sm:$0xff]  ;;  %p1117_p12 = pnand %p1116_p11, %p1281_p5  ;;  %s1119_s14 = sshll.u32 %s1207_s13, 4  ;;  %s1120_s14 = int_to_ptr.vmem [resolvable:$false] %s1119_s14 }
  0x1a   : > { %1038 = vmatpush3.msra.mxu1 %v534_v3  ;;  %1007 = vmatprep.subr.mxu0 %v255_v4  ;;  %v242_v12 = vld [vmem:[%s1319_s9 + $0x20] sm:$0xff]  ;;  %v244_v14 = vld [vmem:[%s1319_s9 + $0x30] sm:$0xff]  ;;  %v245_v15 = vld [vmem:[%s1319_s9 + $0x38] sm:$0xff]  ;;  %s1121_s17 = scalar_lea.vmem %s1120_s14, 2048  ;;  %p1122_p0 = scmp.lt.s32.totalorder %s1428_s23, %s1120_s14 }
  0x1b   : > { %1039 = vmatprep.subr.mxu1 %v533_v5  ;;  %1008 = vmatpush3.msra.mxu0 %v255_v4  ;;  %v246_v16 = vld [vmem:[%s1319_s9 + $0x40] sm:$0xff]  ;;  %v247_v17 = vld [vmem:[%s1319_s9 + $0x48] sm:$0xff]  ;;  %v248_v18 = vld [vmem:[%s1319_s9 + $0x50] sm:$0xff]  ;;  %p1118_p13 = pneg %p1117_p12  ;;  %p1123_p1 = scmp.lt.s32.totalorder %s1121_s17, %s1115_s12 }
  0x1c   : > { %1040 = vmatpush3.msra.mxu1 %v533_v5  ;;  %1009 = vmatprep.subr.mxu0 %v254_v6  ;;  %v249_v19 = vld [vmem:[%s1319_s9 + $0x58] sm:$0xff]  ;;  %v250_v20 = vld [vmem:[%s1319_s9 + $0x60] sm:$0xff]  ;;  %v251_v21 = vld [vmem:[%s1319_s9 + $0x68] sm:$0xff] }
  0x1d   : > { %1041 = vmatprep.subr.mxu1 %v532_v7  ;;  %1010 = vmatpush3.msra.mxu0 %v254_v6  ;;  %v252_v22 = vld [vmem:[%s1319_s9 + $0x70] sm:$0xff]  ;;  %v253_v23 = vld [vmem:[%s1319_s9 + $0x78] sm:$0xff]  ;;  %v1376_v24 = vld [vmem:[%s1507_s3] ss:$0 sm:$0xff]  ;;  %s1435_s9 = scalar_lea.hbm %s1509_s5, %s915_s25  ;;  %p1124_p2 = por %p1123_p1, %p1122_p0 }
  0x1e   : > { %1011 = vmatprep.mubr.msk.f32.mxu0 %vm258_vm0, %v238_v8  ;;  %1042 = vmatpush3.msra.mxu1 %v532_v7 }
  0x1f   : > { %1043 = vmatprep.mubr.msk.f32.mxu1 %vm258_vm0, %v238_v8  ;;  %1012 = vmatmul.mubr.msk.f32.vlgmr.msra.gmra.mxu0 %vm258_vm0, %v239_v9  ;;  %p1125_p3 = pnand %p1124_p2, %p1118_p13 }
  0x20   : > { %1044 = vmatmul.mubr.msk.f32.vlgmr.msra.gmra.mxu1 %vm258_vm0, %v239_v9  ;;  %1014 = vmatprep.mubr.msk.f32.mxu0 %vm258_vm0, %v240_v10 }
  0x21   : > { %1046 = vmatprep.mubr.msk.f32.mxu1 %vm258_vm0, %v240_v10 }
  0x23   : > { %1015 = vmatmul.mubr.msk.f32.gmra.mxu0 %vm258_vm0, %v241_v11 }
  0x24   : > { %1047 = vmatmul.mubr.msk.f32.gmra.mxu1 %vm258_vm0, %v241_v11  ;;  %1017 = vmatprep.mubr.msk.f32.mxu0 %vm258_vm0, %v242_v12 }
  0x25   : > { %1049 = vmatprep.mubr.msk.f32.mxu1 %vm258_vm0, %v242_v12 }
  0x27   : > { %1018 = vmatmul.mubr.msk.f32.gmra.mxu0 %vm258_vm0, %v243_v13 }
  0x28   : > { %1050 = vmatmul.mubr.msk.f32.gmra.mxu1 %vm258_vm0, %v243_v13  ;;  %1020 = vmatprep.mubr.msk.f32.mxu0 %vm258_vm0, %v244_v14 }
  0x29   : > { %1052 = vmatprep.mubr.msk.f32.mxu1 %vm258_vm0, %v244_v14 }
  0x2b   : > { %1021 = vmatmul.mubr.msk.f32.gmra.mxu0 %vm258_vm0, %v245_v15 }
  0x2c   : > { %1053 = vmatmul.mubr.msk.f32.gmra.mxu1 %vm258_vm0, %v245_v15  ;;  %1023 = vmatprep.mubr.msk.f32.mxu0 %vm258_vm0, %v246_v16 }
  0x2d   : > { %1055 = vmatprep.mubr.msk.f32.mxu1 %vm258_vm0, %v246_v16 }
  0x2f   : > { %1024 = vmatmul.mubr.msk.f32.gmra.mxu0 %vm258_vm0, %v247_v17 }
  0x30   : > { %1056 = vmatmul.mubr.msk.f32.gmra.mxu1 %vm258_vm0, %v247_v17  ;;  %1026 = vmatprep.mubr.msk.f32.mxu0 %vm258_vm0, %v248_v18 }
  0x31   : > { %1058 = vmatprep.mubr.msk.f32.mxu1 %vm258_vm0, %v248_v18 }
  0x33   : > { %1027 = vmatmul.mubr.msk.f32.gmra.mxu0 %vm258_vm0, %v249_v19 }
  0x34   : > { %1059 = vmatmul.mubr.msk.f32.gmra.mxu1 %vm258_vm0, %v249_v19  ;;  %1029 = vmatprep.mubr.msk.f32.mxu0 %vm258_vm0, %v250_v20 }
  0x35   : > { %1061 = vmatprep.mubr.msk.f32.mxu1 %vm258_vm0, %v250_v20 }
  0x37   : > { %1030 = vmatmul.mubr.msk.f32.gmra.mxu0 %vm258_vm0, %v251_v21 }
  0x38   : > { %1062 = vmatmul.mubr.msk.f32.gmra.mxu1 %vm258_vm0, %v251_v21  ;;  %1032 = vmatprep.mubr.msk.f32.mxu0 %vm258_vm0, %v252_v22 }
  0x39   : > { %1064 = vmatprep.mubr.msk.f32.mxu1 %vm258_vm0, %v252_v22 }
  0x3b   : > { %1033 = vmatmul.mubr.msk.f32.gmra.mxu0 %vm258_vm0, %v253_v23 }
  0x3c   : > { %1065 = vmatmul.mubr.msk.f32.gmra.mxu1 %vm258_vm0, %v253_v23 }
  0xdf   : > { %v1013_v25 = vpop.f32.mrf.mxu0 }
  0xe0   : > { %v1045_v26 = vpop.f32.mrf.mxu1 }
  0xe1   : > { %v615_v27 = vadd.f32 %v1045_v26, %v1376_v24  ;;  %v373_v28 = vpop.f32.mrf.mxu0 }
  0xe2   : > { %v609_v29 = vpop.f32.mrf.mxu1  ;;  %v919_v30 = vpack.c.bf16 %v1013_v25, %v373_v28 }
  0xe3   : > { %689 = vst [vmem:[%s1380_s15 + $0x8] sm:$0xff] %v615_v27  ;;  %v610_v31 = vadd.f32 %v1376_v24, %v609_v29  ;;  %v1016_v32 = vpop.f32.mrf.mxu0 }
  0xe4   : > { %v1048_v33 = vpop.f32.mrf.mxu1  ;;  %920 = vst [vmem:[%s1384_s16] sm:$0xff] %v919_v30  }
  0xe5   : > { %688 = vst [vmem:[%s1380_s15] sm:$0xff] %v610_v31  ;;  %v625_v34 = vadd.f32 %v1048_v33, %v1376_v24  ;;  %v383_v35 = vpop.f32.mrf.mxu0 }
  0xe6   : > { %v619_v36 = vpop.f32.mrf.mxu1  ;;  %v924_v37 = vpack.c.bf16 %v1016_v32, %v383_v35 }
  0xe7   : > { %691 = vst [vmem:[%s1380_s15 + $0x18] sm:$0xff] %v625_v34  ;;  %v620_v38 = vadd.f32 %v1376_v24, %v619_v36  ;;  %v1019_v39 = vpop.f32.mrf.mxu0 }
  0xe8   : > { %v1051_v40 = vpop.f32.mrf.mxu1  ;;  %956 = vst [vmem:[%s1384_s16 + $0x8] sm:$0xff] %v924_v37  }
  0xe9   : > { %690 = vst [vmem:[%s1380_s15 + $0x10] sm:$0xff] %v620_v38  ;;  %v635_v41 = vadd.f32 %v1051_v40, %v1376_v24  ;;  %v393_v42 = vpop.f32.mrf.mxu0 }
  0xea   : > { %v629_v43 = vpop.f32.mrf.mxu1  ;;  %v929_v44 = vpack.c.bf16 %v1019_v39, %v393_v42 }
  0xeb   : > { %693 = vst [vmem:[%s1380_s15 + $0x28] sm:$0xff] %v635_v41  ;;  %v630_v45 = vadd.f32 %v1376_v24, %v629_v43  ;;  %v1022_v46 = vpop.f32.mrf.mxu0 }
  0xec   : > { %v1054_v47 = vpop.f32.mrf.mxu1  ;;  %957 = vst [vmem:[%s1384_s16 + $0x10] sm:$0xff] %v929_v44  }
  0xed   : > { %692 = vst [vmem:[%s1380_s15 + $0x20] sm:$0xff] %v630_v45  ;;  %v645_v48 = vadd.f32 %v1054_v47, %v1376_v24  ;;  %v403_v49 = vpop.f32.mrf.mxu0 }
  0xee   : > { %v639_v50 = vpop.f32.mrf.mxu1  ;;  %v934_v51 = vpack.c.bf16 %v1022_v46, %v403_v49 }
  0xef   : > { %695 = vst [vmem:[%s1380_s15 + $0x38] sm:$0xff] %v645_v48  ;;  %v640_v52 = vadd.f32 %v1376_v24, %v639_v50  ;;  %v1025_v53 = vpop.f32.mrf.mxu0 }
  0xf0   : > { %v1057_v54 = vpop.f32.mrf.mxu1  ;;  %958 = vst [vmem:[%s1384_s16 + $0x18] sm:$0xff] %v934_v51  }
  0xf1   : > { %694 = vst [vmem:[%s1380_s15 + $0x30] sm:$0xff] %v640_v52  ;;  %v655_v55 = vadd.f32 %v1057_v54, %v1376_v24  ;;  %v413_v56 = vpop.f32.mrf.mxu0 }
  0xf2   : > { %v649_v57 = vpop.f32.mrf.mxu1  ;;  %v939_v58 = vpack.c.bf16 %v1025_v53, %v413_v56 }
  0xf3   : > { %697 = vst [vmem:[%s1380_s15 + $0x48] sm:$0xff] %v655_v55  ;;  %v650_v59 = vadd.f32 %v1376_v24, %v649_v57  ;;  %v1028_v60 = vpop.f32.mrf.mxu0 }
  0xf4   : > { %v1060_v61 = vpop.f32.mrf.mxu1  ;;  %959 = vst [vmem:[%s1384_s16 + $0x20] sm:$0xff] %v939_v58  }
  0xf5   : > { %696 = vst [vmem:[%s1380_s15 + $0x40] sm:$0xff] %v650_v59  ;;  %v665_v62 = vadd.f32 %v1060_v61, %v1376_v24  ;;  %v423_v63 = vpop.f32.mrf.mxu0 }
  0xf6   : > { %v659_v0 = vpop.f32.mrf.mxu1  ;;  %v944_v1 = vpack.c.bf16 %v1028_v60, %v423_v63 }
  0xf7   : > { %699 = vst [vmem:[%s1380_s15 + $0x58] sm:$0xff] %v665_v62  ;;  %v660_v2 = vadd.f32 %v1376_v24, %v659_v0  ;;  %v1031_v3 = vpop.f32.mrf.mxu0 }
  0xf8   : > { %v1063_v4 = vpop.f32.mrf.mxu1  ;;  %960 = vst [vmem:[%s1384_s16 + $0x28] sm:$0xff] %v944_v1  }
  0xf9   : > { %698 = vst [vmem:[%s1380_s15 + $0x50] sm:$0xff] %v660_v2  ;;  %v675_v5 = vadd.f32 %v1063_v4, %v1376_v24  ;;  %v433_v6 = vpop.f32.mrf.mxu0 }
  0xfa   : > { %v669_v7 = vpop.f32.mrf.mxu1  ;;  %v949_v8 = vpack.c.bf16 %v1031_v3, %v433_v6 }
  0xfb   : > { %701 = vst [vmem:[%s1380_s15 + $0x68] sm:$0xff] %v675_v5  ;;  %v670_v9 = vadd.f32 %v1376_v24, %v669_v7  ;;  %v1034_v10 = vpop.f32.mrf.mxu0 }
  0xfc   : > { %v1066_v11 = vpop.f32.mrf.mxu1  ;;  %961 = vst [vmem:[%s1384_s16 + $0x30] sm:$0xff] %v949_v8  }
  0xfd   : > { %700 = vst [vmem:[%s1380_s15 + $0x60] sm:$0xff] %v670_v9  ;;  %v685_v12 = vadd.f32 %v1066_v11, %v1376_v24  ;;  %v443_v13 = vpop.f32.mrf.mxu0 }
  0xfe   : > { %v679_v14 = vpop.f32.mrf.mxu1  ;;  %v954_v15 = vpack.c.bf16 %v1034_v10, %v443_v13 }
  0xff   : > { %703 = vst [vmem:[%s1380_s15 + $0x78] sm:$0xff] %v685_v12  ;;  %v680_v16 = vadd.f32 %v1376_v24, %v679_v14 }
 0x100   : > { %962 = vst [vmem:[%s1384_s16 + $0x38] sm:$0xff] %v954_v15  }
 0x101   : > { %702 = vst [vmem:[%s1380_s15 + $0x70] sm:$0xff] %v680_v16 }
 0x102   : > { %1128 = shalt.err (!%p1125_p3)
}
 0x103   : > { %s1129_s15 = scalar_lea.hbm %s1426_s7, 1024  ;;  %s1133_s30 = scalar_lea.hbm %s1508_s4, 2048 }
 0x104   : > { %p1130_p4 = scmp.ne.s32.totalorder %s1426_s7, %s1129_s15  ;;  %p1134_p9 = scmp.lt.s32.totalorder %s1426_s7, %s1508_s4 }
 0x105   : > { %p1135_p10 = scmp.lt.s32.totalorder %s1133_s30, %s1129_s15 }
 0x106   : > { %p1131_p7 = pnand %p1130_p4, %p1281_p5 }
 0x107   : > { %p1136_p11 = por %p1135_p10, %p1134_p9 }
 0x108   : > { %p1132_p8 = pneg %p1131_p7 }
 0x10a   : > { %p1137_p12 = pnand %p1136_p11, %p1132_p8 }
 0x10c   : > { %1140 = shalt.err (!%p1137_p12)
}
 0x10d   : > { %s1208_s8 = smov 64   ;;  %s1209_s12 = smov 4  }
 0x10e   : > { %1067 = dma.vmem_to_hbm [thread:$0]  (%p1281_p5), %s1428_s23, 1024, %s1426_s7, %s705_s11, %s1208_s8, %s1208_s8, %s1209_s12  }
 0x10f   : > { %s710_s13 = scalar_lea.sflag [#allocation5], %s1370_s10  ;;  %s1141_s14 = scalar_lea.vmem %s1437_s26, 2048 }
 0x110   : > { %p1142_p13 = scmp.ne.s32.totalorder %s1437_s26, %s1141_s14  ;;  %s1210_s17 = smov [#allocation4]  }
 0x111   : > { %s1145_s15 = sshll.u32 %s1210_s17, 4  ;;  %s1146_s15 = int_to_ptr.vmem [resolvable:$false] %s1145_s15 }
 0x112   : > { %p1143_p0 = pnand %p1142_p13, %p1281_p5  ;;  %s1147_s16 = scalar_lea.vmem %s1146_s15, 4096 }
 0x113   : > { %p1148_p2 = scmp.lt.s32.totalorder %s1437_s26, %s1146_s15  ;;  %p1149_p3 = scmp.lt.s32.totalorder %s1147_s16, %s1141_s14 }
 0x114   : > { %p1144_p1 = pneg %p1143_p0 }
 0x115   : > { %p1150_p4 = por %p1149_p3, %p1148_p2 }
 0x117   : > { %p1151_p7 = pnand %p1150_p4, %p1144_p1 }
 0x119   : > { %1154 = shalt.err (!%p1151_p7)
}
 0x11a   : > { %s1155_s23 = scalar_lea.hbm %s1435_s9, 2048  ;;  %s1159_s25 = scalar_lea.hbm %s1509_s5, 4096 }
 0x11b   : > { %p1156_p8 = scmp.ne.s32.totalorder %s1435_s9, %s1155_s23  ;;  %p1160_p11 = scmp.lt.s32.totalorder %s1435_s9, %s1509_s5 }
 0x11c   : > { %p1161_p12 = scmp.lt.s32.totalorder %s1159_s25, %s1155_s23 }
 0x11d   : > { %p1157_p9 = pnand %p1156_p8, %p1281_p5 }
 0x11e   : > { %p1162_p13 = por %p1161_p12, %p1160_p11 }
 0x11f   : > { %p1158_p10 = pneg %p1157_p9 }
 0x121   : > { %p1163_p0 = pnand %p1162_p13, %p1158_p10 }
 0x123   : > { %1166 = shalt.err (!%p1163_p0)
}
 0x124   : > { %s1211_s22 = smov 128   ;;  %s1212_s8 = smov 8  }
 0x125   : > { %1068 = dma.vmem_to_hbm [thread:$0]  (%p1281_p5), %s1437_s26, 2048, %s1435_s9, %s710_s13, %s1211_s22, %s1211_s22, %s1212_s8  }
 0x126 PF: > { %p1078_p1 = scmp.ge.s32.totalorder %s1205_s21, 2  ;;  %s754_s12 = sand.u32 1, %s1193_s18  }
 0x127   : > { %s755_s14 = scalar_lea.sflag [#allocation3], %s754_s12 }
 0x128   : > { %p1072_p2 = pnand %p1078_p1, %p1285_p6 }
 0x12a   : > { %p1073_p3 = pneg %p1072_p2 }
 0x12c   : > { %1184 = dma.done.wait (%p1073_p3), %s755_s14, 1024  }
 0x12d   : > { %1186 = vsyncadd (%p1073_p3), %s755_s14, 4294966272  ;;  %s764_s17 = scalar_lea.sflag [#allocation5], %s754_s12 }
 0x12e   : > { %1188 = dma.done.wait (%p1073_p3), %s764_s17, 2048  }
 0x12f   : > { %1190 = vsyncadd (%p1073_p3), %s764_s17, 4294965248  ;;  %p19_p5 = scmp.ge.s32.totalorder %s1268_s24, 4   ;;  %s1512_s18 = smov %s1197_s19 }
 0x130   : > { %s1513_s19 = smov %s1201_s20  ;;  %s1514_s20 = smov %s1279_s27 }
 0x131   : > { %s1515_s21 = smov %s1268_s24  ;;  %21 = sbr.rel (!%p19_p5) target bundleno = 5 (0x5), region = 88 }
 0x136   :  { %769 = vsyncpa [#allocation3], 1 }
 0x137   :  { %771 = vsyncpa [#allocation3 + $0x1], 1 }
 0x138   :  { %772 = vsyncpa [#allocation5], 1 }
 0x139   :  { %774 = vsyncpa [#allocation5 + $0x1], 1 }

</bundles_post_ra>
